<compile_context>
chip_gen: v7x
topology: tpu7x:2x2x1
jax: 0.10.0
libtpu: 0.0.40
codegen_flags: <defaults>
</compile_context>

<pallas_src>
import functools

import jax
import jax.numpy as jnp
from jax.experimental import pallas as pl
from jax.experimental.pallas import tpu as pltpu


def _round_up(x, m):
    return (x + m - 1) // m * m


def _matmul_bn_act_kernel(x_ref, w_ref, scale_ref, bias_ref, o_ref, acc_ref, *, act):
    """One (tm, tn) output tile of  act(scale * (patches @ w) + bias)."""
    k = pl.program_id(2)  # reduction axis — last grid axis

    @pl.when(k == 0)
    def _init():
        acc_ref[...] = jnp.zeros_like(acc_ref)

    # Single dense MXU matmul per grid step: (tm, tk) @ (tk, tn), f32 acc.
    acc_ref[...] += jnp.dot(x_ref[...], w_ref[...],
                            preferred_element_type=jnp.float32)

    @pl.when(k == pl.num_programs(2) - 1)
    def _finalize():
        y = acc_ref[...] * scale_ref[...] + bias_ref[...]   # folded BN, f32
        if act == "silu":
            y = y * jax.nn.sigmoid(y)
        elif act == "relu":
            y = jnp.maximum(y, 0.0)
        o_ref[...] = y.astype(o_ref.dtype)                  # lane-dense store


@functools.partial(
    jax.jit, static_argnames=("k", "pad", "act", "matmul_dtype", "tile_m"))
def conv_bn_act(x_nchw, w_oihw, gamma, beta, running_mean, running_var,
                *, k=3, pad=None, eps=1e-5, act="silu",
                matmul_dtype=jnp.bfloat16, tile_m=256):
    """Forward of the PyTorch `Conv` / `Conv2d_BN` block (conv->BN->act), stride=1."""
    B, C1, H, W = x_nchw.shape
    C2 = w_oihw.shape[0]
    if pad is None:
        pad = k // 2  # autopad

    # ---- glue (XLA layout plumbing): NCHW->NHWC, spatial pad, im2col ----
    x_nhwc = jnp.transpose(x_nchw, (0, 2, 3, 1))
    x_sp = jnp.pad(x_nhwc, ((0, 0), (pad, pad), (pad, pad), (0, 0)))
    taps = [x_sp[:, kh:kh + H, kw:kw + W, :]
            for kh in range(k) for kw in range(k)]
    patches = jnp.concatenate(taps, axis=-1) if len(taps) > 1 else taps[0]

    Kdim = k * k * C1
    M = B * H * W
    patches = patches.reshape(M, Kdim)

    # Weights as a dense 2-D matmul operand; row order matches im2col order.
    w2d = jnp.transpose(w_oihw, (2, 3, 1, 0)).reshape(Kdim, C2)

    # Folded BatchNorm (eval mode) -> per-output-channel affine (f32).
    scale = (gamma.astype(jnp.float32)
             / jnp.sqrt(running_var.astype(jnp.float32) + eps))
    bias = beta.astype(jnp.float32) - running_mean.astype(jnp.float32) * scale

    # ---- pad everything to MXU / lane friendly shapes ----
    C2p = _round_up(C2, 128)
    tn = 256 if C2p % 256 == 0 else 128          # output tile, multiple of 128

    Kp = _round_up(Kdim, 128)
    tk = min(512, Kp)
    while Kp % tk:                                # Kp % 128 == 0 -> terminates
        tk -= 128

    tm = min(tile_m, _round_up(M, 8))             # rows per tile (mult. of 8)
    Mp = _round_up(M, tm)

    patches = jnp.pad(patches, ((0, Mp - M), (0, Kp - Kdim))).astype(matmul_dtype)
    w2d = jnp.pad(w2d, ((0, Kp - Kdim), (0, C2p - C2))).astype(matmul_dtype)
    scale_p = jnp.pad(scale, (0, C2p - C2)).reshape(1, C2p)
    bias_p = jnp.pad(bias, (0, C2p - C2)).reshape(1, C2p)

    # Explicit VMEM budget (double-buffered tiles + f32 accumulator), with
    # headroom but capped well under v7x's 64 MiB physical VMEM.
    in_b = jnp.dtype(matmul_dtype).itemsize
    out_b = jnp.dtype(x_nchw.dtype).itemsize
    tile_bytes = (2 * (tm * tk + tk * tn) * in_b
                  + 2 * tm * tn * out_b + tm * tn * 4 + 4 * tn * 4)
    vmem_limit = int(min(max(4 * tile_bytes, 16 << 20), 40 << 20))

    grid = (Mp // tm, C2p // tn, Kp // tk)

    out2d = pl.pallas_call(
        functools.partial(_matmul_bn_act_kernel, act=act),
        out_shape=jax.ShapeDtypeStruct((Mp, C2p), x_nchw.dtype),
        grid_spec=pltpu.PrefetchScalarGridSpec(
            num_scalar_prefetch=0,
            grid=grid,
            in_specs=[
                pl.BlockSpec((tm, tk), lambda i, j, kk: (i, kk)),   # patches
                pl.BlockSpec((tk, tn), lambda i, j, kk: (kk, j)),   # weights
                pl.BlockSpec((1, tn), lambda i, j, kk: (0, j)),     # BN scale
                pl.BlockSpec((1, tn), lambda i, j, kk: (0, j)),     # BN bias
            ],
            out_specs=pl.BlockSpec((tm, tn), lambda i, j, kk: (i, j)),
            scratch_shapes=[pltpu.VMEM((tm, tn), jnp.float32)],
        ),
        compiler_params=pltpu.CompilerParams(
            dimension_semantics=("parallel", "parallel", "arbitrary"),
            vmem_limit_bytes=vmem_limit,
        ),
    )(patches, w2d, scale_p, bias_p)

    # ---- glue: drop padding, back to PyTorch NCHW ----
    out = out2d[:M, :C2].reshape(B, H, W, C2)
    return jnp.transpose(out, (0, 3, 1, 2))


def _reference(x, w, gamma, beta, mean, var, *, pad, eps=1e-5, act="silu"):
    y = jax.lax.conv_general_dilated(
        x.astype(jnp.float32), w.astype(jnp.float32),
        window_strides=(1, 1), padding=[(pad, pad), (pad, pad)],
        dimension_numbers=("NCHW", "OIHW", "NCHW"))
    scale = gamma / jnp.sqrt(var + eps)
    bias = beta - mean * scale
    y = y * scale[None, :, None, None] + bias[None, :, None, None]
    if act == "silu":
        y = y * jax.nn.sigmoid(y)
    elif act == "relu":
        y = jnp.maximum(y, 0.0)
    return y


if __name__ == "__main__":
    key = jax.random.PRNGKey(0)
    B, C1, C2, H, W = 2, 4, 8, 16, 16

    k_x, k_w3, k_w1, k_g, k_b, k_m, k_v = jax.random.split(key, 7)
    x = jax.random.normal(k_x, (B, C1, H, W), dtype=jnp.float32)
    gamma = 1.0 + 0.1 * jax.random.normal(k_g, (C2,), dtype=jnp.float32)
    beta = 0.1 * jax.random.normal(k_b, (C2,), dtype=jnp.float32)
    running_mean = 0.1 * jax.random.normal(k_m, (C2,), dtype=jnp.float32)
    running_var = jnp.abs(
        1.0 + 0.1 * jax.random.normal(k_v, (C2,), dtype=jnp.float32))

    # --- 3x3 Conv + BN + SiLU (Bottleneck cv1 / cv2 blocks) ---
    w3 = jax.random.normal(k_w3, (C2, C1, 3, 3), dtype=jnp.float32) * 0.1
    ref3 = _reference(x, w3, gamma, beta, running_mean, running_var, pad=1)

    # bf16 MXU operands (v6e/v7x fast path), f32 accumulation.
    out_bf16 = conv_bn_act(x, w3, gamma, beta, running_mean, running_var, k=3)
    out_bf16 = jax.block_until_ready(out_bf16)
    assert out_bf16.shape == (B, C2, H, W)
    assert jnp.allclose(out_bf16, ref3, atol=5e-2, rtol=5e-2)

    # f32 operand path: strict kernel-correctness check.
    out_f32 = conv_bn_act(x, w3, gamma, beta, running_mean, running_var, k=3,
                          matmul_dtype=jnp.float32)
    out_f32 = jax.block_until_ready(out_f32)
    assert jnp.allclose(out_f32, ref3, atol=1e-4, rtol=1e-4)

    # --- 1x1 Conv + BN + SiLU (C2f cv1 / cv2, Conv2d_BN qkv projections) ---
    w1 = jax.random.normal(k_w1, (C2, C1, 1, 1), dtype=jnp.float32) * 0.1
    ref1 = _reference(x, w1, gamma, beta, running_mean, running_var, pad=0)
    out1 = conv_bn_act(x, w1, gamma, beta, running_mean, running_var, k=1,
                       matmul_dtype=jnp.float32)
    out1 = jax.block_until_ready(out1)
    assert jnp.allclose(out1, ref1, atol=1e-4, rtol=1e-4)

    print("KERNEL_OK")
</pallas_src>

<mosaic_0001>
module attributes {stable_mosaic.version = 11 : i64} {
  func.func @_matmul_bn_act_kernel(%arg0: i32, %arg1: i32, %arg2: i32, %arg3: memref<256x128xbf16, #tpu.memory_space<vmem>>, %arg4: memref<128x128xbf16, #tpu.memory_space<vmem>>, %arg5: memref<1x128xf32, #tpu.memory_space<vmem>>, %arg6: memref<1x128xf32, #tpu.memory_space<vmem>>, %arg7: memref<256x128xf32, #tpu.memory_space<vmem>>, %arg8: memref<256x128xf32, #tpu.memory_space<vmem>>) attributes {dimension_semantics = [#tpu.dimension_semantics<parallel>, #tpu.dimension_semantics<parallel>, #tpu.dimension_semantics<arbitrary>], iteration_bounds = array<i64: 2, 1, 1>, scalar_prefetch = 0 : i64, scratch_operands = 1 : i64, tpu.core_type = #tpu.core_type<tc>, window_params = [{transform_indices = @transform_0, window_bounds = array<i64: 256, 128>}, {transform_indices = @transform_1, window_bounds = array<i64: 128, 128>}, {transform_indices = @transform_2, window_bounds = array<i64: 1, 128>}, {transform_indices = @transform_3, window_bounds = array<i64: 1, 128>}, {transform_indices = @transform_4, window_bounds = array<i64: 256, 128>}]} {
    %c0_i32 = arith.constant 0 : i32
    %0 = arith.cmpi eq, %arg2, %c0_i32 : i32
    %1 = arith.extui %0 : i1 to i32
    %c0_i32_0 = arith.constant 0 : i32
    %2 = arith.cmpi ne, %1, %c0_i32_0 : i32
    scf.if %2 {
      %cst_10 = arith.constant 0.000000e+00 : f32
      %12 = vector.broadcast %cst_10 : f32 to vector<256x128xf32>
      %c0_11 = arith.constant 0 : index
      %c0_12 = arith.constant 0 : index
      %13 = vector.load %arg8[%c0_11, %c0_12] : memref<256x128xf32, #tpu.memory_space<vmem>>, vector<256x128xf32>
      tpu.vector_store %arg8[%c0_11, %c0_12], %12 {strides = array<i32>} : memref<256x128xf32, #tpu.memory_space<vmem>>, vector<256x128xf32>,
    } else {
    }
    %c0 = arith.constant 0 : index
    %c0_1 = arith.constant 0 : index
    %3 = vector.load %arg8[%c0, %c0_1] : memref<256x128xf32, #tpu.memory_space<vmem>>, vector<256x128xf32>
    %c0_2 = arith.constant 0 : index
    %c0_3 = arith.constant 0 : index
    %4 = vector.load %arg3[%c0_2, %c0_3] : memref<256x128xbf16, #tpu.memory_space<vmem>>, vector<256x128xbf16>
    %c0_4 = arith.constant 0 : index
    %c0_5 = arith.constant 0 : index
    %5 = vector.load %arg4[%c0_4, %c0_5] : memref<128x128xbf16, #tpu.memory_space<vmem>>, vector<128x128xbf16>
    %cst = arith.constant dense<0.000000e+00> : vector<256x128xf32>
    %6 = tpu.matmul %4, %5, %cst {dimension_numbers = #tpu.dot_dimension_numbers<[1], [0], [0], [1], [0, 0, 1, 1], [], []>} : vector<256x128xbf16>, vector<128x128xbf16>, vector<256x128xf32> -> vector<256x128xf32>
    %7 = arith.addf %3, %6 : vector<256x128xf32>
    %c0_6 = arith.constant 0 : index
    %c0_7 = arith.constant 0 : index
    %8 = vector.load %arg8[%c0_6, %c0_7] : memref<256x128xf32, #tpu.memory_space<vmem>>, vector<256x128xf32>
    tpu.vector_store %arg8[%c0_6, %c0_7], %7 {strides = array<i32>} : memref<256x128xf32, #tpu.memory_space<vmem>>, vector<256x128xf32>,
    %c0_i32_8 = arith.constant 0 : i32
    %9 = arith.cmpi eq, %arg2, %c0_i32_8 : i32
    %10 = arith.extui %9 : i1 to i32
    %c0_i32_9 = arith.constant 0 : i32
    %11 = arith.cmpi ne, %10, %c0_i32_9 : i32
    scf.if %11 {
      %c0_10 = arith.constant 0 : index
      %c0_11 = arith.constant 0 : index
      %12 = vector.load %arg8[%c0_10, %c0_11] : memref<256x128xf32, #tpu.memory_space<vmem>>, vector<256x128xf32>
      %c0_12 = arith.constant 0 : index
      %c0_13 = arith.constant 0 : index
      %13 = vector.load %arg5[%c0_12, %c0_13] : memref<1x128xf32, #tpu.memory_space<vmem>>, vector<1x128xf32>
      %14 = vector.broadcast %13 : vector<1x128xf32> to vector<256x128xf32>
      %15 = arith.mulf %12, %14 : vector<256x128xf32>
      %c0_14 = arith.constant 0 : index
      %c0_15 = arith.constant 0 : index
      %16 = vector.load %arg6[%c0_14, %c0_15] : memref<1x128xf32, #tpu.memory_space<vmem>>, vector<1x128xf32>
      %17 = vector.broadcast %16 : vector<1x128xf32> to vector<256x128xf32>
      %18 = arith.addf %15, %17 : vector<256x128xf32>
      %19 = arith.negf %18 : vector<256x128xf32>
      %20 = math.exp %19 : vector<256x128xf32>
      %cst_16 = arith.constant 1.000000e+00 : f32
      %21 = vector.broadcast %cst_16 : f32 to vector<256x128xf32>
      %22 = arith.addf %21, %20 : vector<256x128xf32>
      %23 = arith.divf %21, %22 : vector<256x128xf32>
      %24 = arith.mulf %18, %23 : vector<256x128xf32>
      %c0_17 = arith.constant 0 : index
      %c0_18 = arith.constant 0 : index
      %25 = vector.load %arg7[%c0_17, %c0_18] : memref<256x128xf32, #tpu.memory_space<vmem>>, vector<256x128xf32>
      tpu.vector_store %arg7[%c0_17, %c0_18], %24 {strides = array<i32>} : memref<256x128xf32, #tpu.memory_space<vmem>>, vector<256x128xf32>,
    } else {
    }
    return
  }
  func.func @transform_0(%arg0: i32, %arg1: i32, %arg2: i32) -> (i32, i32) {
    %c0_i32 = arith.constant 0 : i32
    return %arg0, %arg2 : i32, i32
  }
  func.func @transform_1(%arg0: i32, %arg1: i32, %arg2: i32) -> (i32, i32) {
    %c0_i32 = arith.constant 0 : i32
    return %arg2, %arg1 : i32, i32
  }
  func.func @transform_2(%arg0: i32, %arg1: i32, %arg2: i32) -> (i32, i32) {
    %c0_i32 = arith.constant 0 : i32
    %c0_i32_0 = arith.constant 0 : i32
    return %c0_i32, %arg1 : i32, i32
  }
  func.func @transform_3(%arg0: i32, %arg1: i32, %arg2: i32) -> (i32, i32) {
    %c0_i32 = arith.constant 0 : i32
    %c0_i32_0 = arith.constant 0 : i32
    return %c0_i32, %arg1 : i32, i32
  }
  func.func @transform_4(%arg0: i32, %arg1: i32, %arg2: i32) -> (i32, i32) {
    %c0_i32 = arith.constant 0 : i32
    return %arg0, %arg1 : i32, i32
  }
}

</mosaic_0001>

<bundles_post_ra>
// kernel: conv_bn_act.1
= control target key start
LH: loop header
LB: loop body
LE: loop exit
PB: predicated region body
PF: predicated region fallthrough
CT: control target
= control target key end

     0   :  { %s1663_s15 = smov 0   ;;  %s1665_s16 = smov 0   ;;  %s1999_s0 = inlined_call_operand.vmem [shape: bf16[512,128], index: 0, kind: input, shape index: {}]   ;;  %s2000_s1 = inlined_call_operand.vmem [shape: bf16[128,128], index: 1, kind: input, shape index: {}]   ;;  %s2001_s2 = inlined_call_operand.vmem [shape: f32[1,128], index: 2, kind: input, shape index: {}]   ;;  %s2002_s3 = inlined_call_operand.vmem [shape: f32[1,128], index: 3, kind: input, shape index: {}]   ;;  %s2003_s4 = inlined_call_operand.vmem [shape: f32[512,128], index: 4, kind: output, shape index: {}]  }
   0x1   :  { %s1667_s17 = smov 0  }
   0x2 LB: > { %s33_s18 = sadd.s32 1, %s1632_s16  ;;  %p1285_p0 = scmp.ge.s32.totalorder %s1636_s17, 1  ;;  %s1636_s17 = sphi %s1667_s17, %s14_s17   ;;  %s1632_s16 = sphi %s1665_s16, %s2005_s16   ;;  %s1628_s15 = sphi %s1663_s15, %s2004_s15  }
   0x3   : > { %p35_p1 = scmp.ge.s32.totalorder %s33_s18, 2  ;;  %p221_p2 = scmp.lt.s32.totalorder %s1636_s17, 3 }
   0x5   : > { %s2007_s18 = smov (%p35_p1, %s33_s18), 0  ;;  %p222_p3 = pnand %p1285_p0, %p221_p2 }
   0x6   : > { %v1462_v0 = vld [vmem:[%s2000_s1] sm:$0xff] (!%p222_p3)   ;;  %s1286_s21 = sshll.u32 (!%p222_p3), %s1628_s15, 5  ;;  %v1463_v1 = vld [vmem:[%s2000_s1 + $0x8] sm:$0xff] (!%p222_p3)   ;;  %v1464_v2 = vld [vmem:[%s2000_s1 + $0x10] sm:$0xff] (!%p222_p3)  }
   0x7   : > { %225 = sbr.rel (%p222_p3) target bundleno = 343 (0x157), region = 36  ;;  %p268_p4 = scmp.lt.s32.totalorder (!%p222_p3), %s1286_s21, 63  ;;  %1374 = vmatprep.subr.bf16.mxu0 (!%p222_p3), %v1462_v0  ;;  %1422 = vmatprep.subr.bf16.mxu1 (!%p222_p3), %v1462_v0  ;;  %v1465_v3 = vld [vmem:[%s2000_s1 + $0x18] sm:$0xff] (!%p222_p3)   ;;  %v1466_v6 = vld [vmem:[%s2000_s1 + $0x20] sm:$0xff] (!%p222_p3)   ;;  %v1467_v7 = vld [vmem:[%s2000_s1 + $0x28] sm:$0xff] (!%p222_p3)  }
   0x8   : > { %1375 = vmatpush3.bf16.msra.mxu0 (!%p222_p3), %v1462_v0  ;;  %1430 = vmatpush3.bf16.msra.mxu1 (!%p222_p3), %v1462_v0  ;;  %v1468_v8 = vld [vmem:[%s2000_s1 + $0x30] sm:$0xff] (!%p222_p3)   ;;  %v1469_v9 = vld [vmem:[%s2000_s1 + $0x38] sm:$0xff] (!%p222_p3)   ;;  %v1732_v24 = vld [vmem:[%s2001_s2] ss:$0 sm:$0xff] (!%p222_p3) }
   0x9   : > { %1376 = vmatprep.subr.bf16.mxu0 (!%p222_p3), %v1463_v1  ;;  %1423 = vmatprep.subr.bf16.mxu1 (!%p222_p3), %v1463_v1  ;;  %v1737_v26 = vld [vmem:[%s2002_s3] ss:$0 sm:$0xff] (!%p222_p3) }
   0xc   : > { %1377 = vmatpush3.bf16.msra.mxu0 (!%p222_p3), %v1463_v1  ;;  %1431 = vmatpush3.bf16.msra.mxu1 (!%p222_p3), %v1463_v1 }
   0xd   : > { %1378 = vmatprep.subr.bf16.mxu0 (!%p222_p3), %v1464_v2  ;;  %1424 = vmatprep.subr.bf16.mxu1 (!%p222_p3), %v1464_v2 }
   0xe   : > { %s2009_s21 = smov (!%p268_p4, %s1286_s21), 63 }
   0xf   : > { %s1287_s26 = sshll.u32 %s2009_s21, 2  ;;  %s1289_s22 = sshll.u32 %s2009_s21, 3 }
  0x10   : > { %s1696_s29 = scalar_lea.vmem %s1999_s0, %s1287_s26  ;;  %1379 = vmatpush3.bf16.msra.mxu0 %v1464_v2  ;;  %1432 = vmatpush3.bf16.msra.mxu1 %v1464_v2  ;;  %s1853_s24 = scalar_lea.vmem %s2003_s4, %s1289_s22 }
  0x11   : > { %v1470_v4 = vld [vmem:[%s1696_s29] sm:$0xff]   ;;  %1380 = vmatprep.subr.bf16.mxu0 %v1465_v3  ;;  %1425 = vmatprep.subr.bf16.mxu1 %v1465_v3  ;;  %v1472_v10 = vld [vmem:[%s1696_s29 + $0x8] sm:$0xff]   ;;  %v1474_v12 = vld [vmem:[%s1696_s29 + $0x10] sm:$0xff]  }
  0x12   : > { %v1471_v5 = vld [vmem:[%s1696_s29 + $0x40] sm:$0xff]   ;;  %1390 = vmatprep.mubr.bf16.mxu0 %v1470_v4  ;;  %v1473_v11 = vld [vmem:[%s1696_s29 + $0x48] sm:$0xff]   ;;  %v1475_v13 = vld [vmem:[%s1696_s29 + $0x50] sm:$0xff]  }
  0x13   : > { %1406 = vmatprep.mubr.bf16.mxu1 %v1471_v5  ;;  %v1476_v14 = vld [vmem:[%s1696_s29 + $0x18] sm:$0xff]   ;;  %v1478_v16 = vld [vmem:[%s1696_s29 + $0x20] sm:$0xff]   ;;  %v1480_v18 = vld [vmem:[%s1696_s29 + $0x28] sm:$0xff]  }
  0x14   : > { %1381 = vmatpush3.bf16.msra.mxu0 %v1465_v3  ;;  %1433 = vmatpush3.bf16.msra.mxu1 %v1465_v3  ;;  %v1477_v15 = vld [vmem:[%s1696_s29 + $0x58] sm:$0xff]   ;;  %v1479_v17 = vld [vmem:[%s1696_s29 + $0x60] sm:$0xff]   ;;  %v1481_v19 = vld [vmem:[%s1696_s29 + $0x68] sm:$0xff]  }
  0x15   : > { %1382 = vmatprep.subr.bf16.mxu0 %v1466_v6  ;;  %1426 = vmatprep.subr.bf16.mxu1 %v1466_v6  ;;  %v1482_v20 = vld [vmem:[%s1696_s29 + $0x30] sm:$0xff]   ;;  %v1484_v22 = vld [vmem:[%s1696_s29 + $0x38] sm:$0xff]  }
  0x16   : > { %v1483_v21 = vld [vmem:[%s1696_s29 + $0x70] sm:$0xff]   ;;  %v1485_v23 = vld [vmem:[%s1696_s29 + $0x78] sm:$0xff]  }
  0x18   : > { %1383 = vmatpush3.bf16.msra.mxu0 %v1466_v6  ;;  %1434 = vmatpush3.bf16.msra.mxu1 %v1466_v6 }
  0x19   : > { %1384 = vmatprep.subr.bf16.mxu0 %v1467_v7  ;;  %1427 = vmatprep.subr.bf16.mxu1 %v1467_v7 }
  0x1c   : > { %1385 = vmatpush3.bf16.msra.mxu0 %v1467_v7  ;;  %1435 = vmatpush3.bf16.msra.mxu1 %v1467_v7 }
  0x1d   : > { %1386 = vmatprep.subr.bf16.mxu0 %v1468_v8  ;;  %1428 = vmatprep.subr.bf16.mxu1 %v1468_v8 }
  0x20   : > { %1387 = vmatpush3.bf16.msra.mxu0 %v1468_v8  ;;  %1436 = vmatpush3.bf16.msra.mxu1 %v1468_v8 }
  0x21   : > { %1388 = vmatprep.subr.bf16.mxu0 %v1469_v9  ;;  %1429 = vmatprep.subr.bf16.mxu1 %v1469_v9 }
  0x24   : > { %1389 = vmatpush3.bf16.msra.mxu0 %v1469_v9  ;;  %1437 = vmatpush3.bf16.msra.mxu1 %v1469_v9 }
  0x27   : > { %1391 = vmatmul.mubr.bf16.vlgmr.msra.gmra.mrb[0].mxu0 %v1472_v10  ;;  %1407 = vmatmul.mubr.bf16.vlgmr.msra.gmra.mrb[0].mxu1 %v1473_v11 }
  0x28   : > { %1394 = vmatprep.mubr.bf16.mxu0 %v1474_v12  ;;  %1410 = vmatprep.mubr.bf16.mxu1 %v1475_v13 }
  0x2f   : > { %1395 = vmatmul.mubr.bf16.gmra.mrb[4].mxu0 %v1476_v14  ;;  %1411 = vmatmul.mubr.bf16.gmra.mrb[4].mxu1 %v1477_v15 }
  0x30   : > { %1398 = vmatprep.mubr.bf16.mxu0 %v1478_v16  ;;  %1414 = vmatprep.mubr.bf16.mxu1 %v1479_v17 }
  0x37   : > { %1399 = vmatmul.mubr.bf16.gmra.mrb[8].mxu0 %v1480_v18  ;;  %1415 = vmatmul.mubr.bf16.gmra.mrb[8].mxu1 %v1481_v19 }
  0x38   : > { %1402 = vmatprep.mubr.bf16.mxu0 %v1482_v20  ;;  %1418 = vmatprep.mubr.bf16.mxu1 %v1483_v21 }
  0x3f   : > { %1403 = vmatmul.mubr.bf16.gmra.mrb[12].mxu0 %v1484_v22  ;;  %1419 = vmatmul.mubr.bf16.gmra.mrb[12].mxu1 %v1485_v23 }
  0xfa   : > { %v1392_v25 = vpop.f32.mrb[0].mxu0  ;;  %v1408_v27 = vpop.f32.mrb[0].mxu1 }
  0xfb   : > { %v830_v28 = vmul.f32 %v1392_v25, %v1732_v24  ;;  %v846_v29 = vmul.f32 %v1408_v27, %v1732_v24  ;;  %v595_v30 = vpop.f32.mrb[1].mxu0  ;;  %v659_v31 = vpop.f32.mrb[1].mxu1 }
  0xfc   : > { %v828_v32 = vmul.f32 %v1732_v24, %v595_v30  ;;  %v844_v33 = vmul.f32 %v1732_v24, %v659_v31  ;;  %v1393_v34 = vpop.f32.mrb[2].mxu0  ;;  %v1409_v35 = vpop.f32.mrb[2].mxu1 }
  0xfd   : > { %v1744_v36 = vadd.f32 %v1737_v26, %v830_v28  ;;  %v1747_v37 = vadd.f32 %v1737_v26, %v846_v29  ;;  %v831_v38 = vmul.f32 %v1393_v34, %v1732_v24  ;;  %v847_v39 = vmul.f32 %v1409_v35, %v1732_v24  ;;  %v598_v40 = vpop.f32.mrb[3].mxu0  ;;  %v662_v41 = vpop.f32.mrb[3].mxu1 }
  0xfe   : > { %v1752_v42 = vadd.f32 %v1737_v26, %v828_v32  ;;  %v1755_v43 = vadd.f32 %v1737_v26, %v844_v33  ;;  %v829_v44 = vmul.f32 %v1732_v24, %v598_v40  ;;  %v845_v45 = vmul.f32 %v1732_v24, %v662_v41 }
  0xff   : > { %v1318_v46 = vmul.f32 -1.442695, %v1744_v36  ;;  %v1334_v47 = vmul.f32 -1.442695, %v1747_v37  ;;  %v1762_v48 = vadd.f32 %v1737_v26, %v831_v38  ;;  %v1765_v49 = vadd.f32 %v1737_v26, %v847_v39 }
 0x100   : > { %v1316_v50 = vmul.f32 -1.442695, %v1752_v42  ;;  %v1332_v51 = vmul.f32 -1.442695, %v1755_v43  ;;  %v1770_v52 = vadd.f32 %v1737_v26, %v829_v44  ;;  %v1773_v53 = vadd.f32 %v1737_v26, %v845_v45 }
 0x101   : > { %1486 = vpow2.f32 %v1318_v46  ;;  %v1319_v54 = vmul.f32 -1.442695, %v1762_v48  ;;  %v1335_v55 = vmul.f32 -1.442695, %v1765_v49 }
 0x102   : > { %1488 = vpow2.f32 %v1334_v47  ;;  %v1396_v56 = vpop.f32.mrb[4].mxu0  ;;  %v1412_v57 = vpop.f32.mrb[4].mxu1  ;;  %v1317_v58 = vmul.f32 -1.442695, %v1770_v52  ;;  %v1333_v63 = vmul.f32 -1.442695, %v1773_v53 }
 0x103   : > { %1490 = vpow2.f32 %v1316_v50  ;;  %v834_v59 = vmul.f32 %v1396_v56, %v1732_v24  ;;  %v850_v60 = vmul.f32 %v1412_v57, %v1732_v24  ;;  %v611_v61 = vpop.f32.mrb[5].mxu0  ;;  %v675_v62 = vpop.f32.mrb[5].mxu1 }
 0x104   : > { %1492 = vpow2.f32 %v1332_v51  ;;  %v832_v0 = vmul.f32 %v1732_v24, %v611_v61  ;;  %v848_v1 = vmul.f32 %v1732_v24, %v675_v62  ;;  %v1397_v2 = vpop.f32.mrb[6].mxu0  ;;  %v1413_v3 = vpop.f32.mrb[6].mxu1 }
 0x105   : > { %1494 = vpow2.f32 %v1319_v54  ;;  %v1784_v4 = vadd.f32 %v1737_v26, %v834_v59  ;;  %v1787_v5 = vadd.f32 %v1737_v26, %v850_v60  ;;  %v835_v6 = vmul.f32 %v1397_v2, %v1732_v24  ;;  %v614_v7 = vpop.f32.mrb[7].mxu0  ;;  %v678_v8 = vpop.f32.mrb[7].mxu1 }
 0x106   : > { %1496 = vpow2.f32 %v1335_v55  ;;  %v1791_v9 = vadd.f32 %v1737_v26, %v832_v0  ;;  %v1794_v10 = vadd.f32 %v1737_v26, %v848_v1  ;;  %v851_v20 = vmul.f32 %v1413_v3, %v1732_v24 }
 0x107   : > { %1498 = vpow2.f32 %v1317_v58  ;;  %v1322_v11 = vmul.f32 -1.442695, %v1784_v4  ;;  %v1338_v12 = vmul.f32 -1.442695, %v1787_v5  ;;  %v1799_v13 = vadd.f32 %v1737_v26, %v835_v6 }
 0x108   : > { %1500 = vpow2.f32 %v1333_v63  ;;  %v1320_v14 = vmul.f32 -1.442695, %v1791_v9  ;;  %v1336_v15 = vmul.f32 -1.442695, %v1794_v10  ;;  %v833_v27 = vmul.f32 %v1732_v24, %v614_v7 }
 0x109   : > { %1502 = vpow2.f32 %v1322_v11  ;;  %v1323_v16 = vmul.f32 -1.442695, %v1799_v13  ;;  %v849_v32 = vmul.f32 %v1732_v24, %v678_v8  ;;  %v1810_v41 = vadd.f32 %v1737_v26, %v851_v20 }
 0x10a   : > { %1504 = vpow2.f32 %v1338_v12  ;;  %v1400_v17 = vpop.f32.mrb[8].mxu0  ;;  %v1416_v18 = vpop.f32.mrb[8].mxu1  ;;  %v1814_v47 = vadd.f32 %v1737_v26, %v833_v27 }
 0x10b   : > { %v1487_v19 = vpop.eup %1486  ;;  %1506 = vpow2.f32 %v1320_v14  ;;  %v627_v21 = vpop.f32.mrb[9].mxu0  ;;  %v838_v44 = vmul.f32 %v1400_v17, %v1732_v24  ;;  %v854_v50 = vmul.f32 %v1416_v18, %v1732_v24  ;;  %v1818_v55 = vadd.f32 %v1737_v26, %v849_v32 }
 0x10c   : > { %v691_v22 = vpop.f32.mrb[9].mxu1  ;;  %v1489_v23 = vpop.eup %1488  ;;  %v997_v25 = vadd.f32 1.0, %v1487_v19  ;;  %1508 = vpow2.f32 %v1336_v15  ;;  %v836_v58 = vmul.f32 %v1732_v24, %v627_v21  ;;  %v1339_v63 = vmul.f32 -1.442695, %v1810_v41 }
 0x10d   : > { %v1401_v28 = vpop.f32.mrb[10].mxu0  ;;  %v1417_v29 = vpop.f32.mrb[10].mxu1  ;;  %v1013_v31 = vadd.f32 1.0, %v1489_v23  ;;  %1510 = vpow2.f32 %v1323_v16  ;;  %v1823_v0 = vadd.f32 %v1737_v26, %v838_v44  ;;  %v1321_v7 = vmul.f32 -1.442695, %v1814_v47 }
 0x10e   : > { %v1491_v30 = vpop.eup %1490  ;;  %v630_v33 = vpop.f32.mrb[11].mxu0  ;;  %1512 = vrcp.f32 %v997_v25  ;;  %v1831_v8 = vadd.f32 %v1737_v26, %v854_v50  ;;  %v1337_v16 = vmul.f32 -1.442695, %v1818_v55  ;;  %v852_v17 = vmul.f32 %v1732_v24, %v691_v22 }
 0x10f   : > { %v1493_v34 = vpop.eup %1492  ;;  %v995_v35 = vadd.f32 1.0, %v1491_v30  ;;  %v1807_v38 = vpop.f32.mrb[11].mxu1  ;;  %1514 = vrcp.f32 %v1013_v31  ;;  %v1845_v23 = vadd.f32 %v1737_v26, %v836_v58  ;;  %v839_v25 = vmul.f32 %v1401_v28, %v1732_v24 }
 0x110   : > { %v1495_v39 = vpop.eup %1494  ;;  %v1011_v40 = vadd.f32 1.0, %v1493_v34  ;;  %v1326_v31 = vmul.f32 -1.442695, %v1823_v0  ;;  %v855_v32 = vmul.f32 %v1417_v29, %v1732_v24  ;;  %v837_v28 = vmul.f32 %v1732_v24, %v630_v33 }
 0x111   : > { %v1497_v45 = vpop.eup %1496  ;;  %1516 = vrcp.f32 %v995_v35  ;;  %v998_v46 = vadd.f32 1.0, %v1495_v39  ;;  %v1342_v35 = vmul.f32 -1.442695, %v1831_v8  ;;  %v1859_v29 = vadd.f32 %v1737_v26, %v852_v17 }
 0x112   : > { %v1499_v51 = vpop.eup %1498  ;;  %1518 = vrcp.f32 %v1011_v40  ;;  %v1014_v54 = vadd.f32 1.0, %v1497_v45  ;;  %v1404_v59 = vpop.f32.mrb[12].mxu0  ;;  %v853_v44 = vmul.f32 %v1732_v24, %v1807_v38  ;;  %v1865_v50 = vadd.f32 %v1737_v26, %v839_v25 }
 0x113   : > { %v1501_v56 = vpop.eup %1500  ;;  %1520 = vrcp.f32 %v998_v46  ;;  %v996_v57 = vadd.f32 1.0, %v1499_v51  ;;  %v1420_v60 = vpop.f32.mrb[12].mxu1  ;;  %v842_v33 = vmul.f32 %v1404_v59, %v1732_v24  ;;  %v1878_v58 = vadd.f32 %v1737_v26, %v837_v28 }
 0x114   : > { %v1503_v61 = vpop.eup %1502  ;;  %1522 = vrcp.f32 %v1014_v54  ;;  %v1012_v62 = vadd.f32 1.0, %v1501_v56  ;;  %v1825_v1 = vpop.f32.mrb[13].mxu0  ;;  %v1871_v54 = vadd.f32 %v1737_v26, %v855_v32  ;;  %v858_v38 = vmul.f32 %v1420_v60, %v1732_v24 }
 0x115   : > { %v1827_v2 = vpop.f32.mrb[13].mxu1  ;;  %v1505_v3 = vpop.eup %1504  ;;  %1524 = vrcp.f32 %v996_v57  ;;  %v1001_v6 = vadd.f32 1.0, %v1503_v61  ;;  %v1324_v57 = vmul.f32 -1.442695, %v1845_v23  ;;  %v1340_v61 = vmul.f32 -1.442695, %v1859_v29 }
 0x116   : > { %v1833_v11 = vpop.f32.mrb[14].mxu0  ;;  %v1835_v12 = vpop.f32.mrb[14].mxu1  ;;  %1526 = vrcp.f32 %v1012_v62  ;;  %v1017_v15 = vadd.f32 1.0, %v1505_v3  ;;  %v1884_v60 = vadd.f32 %v1737_v26, %v853_v44  ;;  %v1890_v3 = vadd.f32 %v1737_v26, %v842_v33 }
 0x117   : > { %v1507_v14 = vpop.eup %1506  ;;  %v1840_v18 = vpop.f32.mrb[15].mxu0  ;;  %1528 = vrcp.f32 %v1001_v6  ;;  %v856_v33 = vmul.f32 %v1732_v24, %v1827_v2 }
 0x118   : > { %v1842_v19 = vpop.f32.mrb[15].mxu1  ;;  %v1509_v20 = vpop.eup %1508  ;;  %v999_v21 = vadd.f32 1.0, %v1507_v14  ;;  %1530 = vrcp.f32 %v1017_v15  ;;  %v1896_v14 = vadd.f32 %v1737_v26, %v858_v38  ;;  %v843_v38 = vmul.f32 %v1833_v11, %v1732_v24 }
 0x119   : > { %v1511_v27 = vpop.eup %1510  ;;  %v1015_v30 = vadd.f32 1.0, %v1509_v20  ;;  %v841_v2 = vmul.f32 %v1732_v24, %v1840_v18  ;;  %v1930_v11 = vadd.f32 %v1737_v26, %v856_v33 }
 0x11a   : > { %v1513_v22 = vpop.eup %1512  ;;  %1532 = vrcp.f32 %v999_v21  ;;  %v1002_v34 = vadd.f32 1.0, %v1511_v27 }
 0x11b   : > { %v1515_v39 = vpop.eup %1514  ;;  %v1093_v40 = vmul.f32 %v1513_v22, %v1744_v36  ;;  %1534 = vrcp.f32 %v1015_v30 }
 0x11c   : > { %v1517_v45 = vpop.eup %1516  ;;  %v1109_v46 = vmul.f32 %v1515_v39, %v1747_v37  ;;  %1536 = vrcp.f32 %v1002_v34 }
 0x11d   : > { %v1519_v51 = vpop.eup %1518  ;;  %1125 = vst [vmem:[%s1853_s24 + $0x10] sm:$0xff] %v1093_v40  ;;  %v1091_v36 = vmul.f32 %v1517_v45, %v1752_v42  ;;  %1538 = vpow2.f32 %v1339_v63  ;;  %v1327_v63 = vmul.f32 -1.442695, %v1865_v50  ;;  %v840_v45 = vmul.f32 %v1732_v24, %v1825_v1 }
 0x11e   : > { %v1521_v56 = vpop.eup %1520  ;;  %1141 = vst [vmem:[%s1853_s24 + $0x90] sm:$0xff] %v1109_v46  ;;  %v1107_v37 = vmul.f32 %v1519_v51, %v1755_v43  ;;  %1540 = vpow2.f32 %v1321_v7  ;;  %v1343_v7 = vmul.f32 -1.442695, %v1871_v54 }
 0x11f   : > { %v1523_v59 = vpop.eup %1522  ;;  %1123 = vst [vmem:[%s1853_s24] sm:$0xff] %v1091_v36  ;;  %v1094_v42 = vmul.f32 %v1521_v56, %v1762_v48  ;;  %1542 = vpow2.f32 %v1337_v16  ;;  %v1325_v16 = vmul.f32 -1.442695, %v1878_v58 }
 0x120   : > { %v1525_v62 = vpop.eup %1524  ;;  %1139 = vst [vmem:[%s1853_s24 + $0x80] sm:$0xff] %v1107_v37  ;;  %v1110_v43 = vmul.f32 %v1523_v59, %v1765_v49  ;;  %1544 = vpow2.f32 %v1326_v31 }
 0x121   : > { %v1527_v6 = vpop.eup %1526  ;;  %1126 = vst [vmem:[%s1853_s24 + $0x18] sm:$0xff] %v1094_v42  ;;  %v1092_v48 = vmul.f32 %v1525_v62, %v1770_v52  ;;  %1546 = vpow2.f32 %v1342_v35  ;;  %v1341_v52 = vmul.f32 -1.442695, %v1884_v60  ;;  %v1925_v42 = vadd.f32 %v1737_v26, %v840_v45 }
 0x122   : > { %v1529_v15 = vpop.eup %1528  ;;  %1142 = vst [vmem:[%s1853_s24 + $0x98] sm:$0xff] %v1110_v43  ;;  %v1108_v49 = vmul.f32 %v1527_v6, %v1773_v53  ;;  %1548 = vpow2.f32 %v1324_v57  ;;  %v1330_v53 = vmul.f32 -1.442695, %v1890_v3  ;;  %v859_v57 = vmul.f32 %v1835_v12, %v1732_v24 }
 0x123   : > { %v1531_v17 = vpop.eup %1530  ;;  %1124 = vst [vmem:[%s1853_s24 + $0x8] sm:$0xff] %v1092_v48  ;;  %v1097_v20 = vmul.f32 %v1529_v15, %v1784_v4  ;;  %1550 = vpow2.f32 %v1340_v61  ;;  %v1346_v4 = vmul.f32 -1.442695, %v1896_v14  ;;  %v857_v43 = vmul.f32 %v1732_v24, %v1842_v19 }
 0x124   : > { %v1533_v21 = vpop.eup %1532  ;;  %1140 = vst [vmem:[%s1853_s24 + $0x88] sm:$0xff] %v1108_v49  ;;  %v1113_v25 = vmul.f32 %v1531_v17, %v1787_v5  ;;  %1552 = vpow2.f32 %v1327_v63  ;;  %v1935_v6 = vadd.f32 %v1737_v26, %v843_v38  ;;  %v1938_v18 = vadd.f32 %v1737_v26, %v859_v57 }
 0x125   : > { %v1535_v27 = vpop.eup %1534  ;;  %1129 = vst [vmem:[%s1853_s24 + $0x30] sm:$0xff] %v1097_v20  ;;  %v1095_v30 = vmul.f32 %v1533_v21, %v1791_v9  ;;  %1554 = vpow2.f32 %v1343_v7  ;;  %v1942_v24 = vadd.f32 %v1737_v26, %v841_v2  ;;  %v1344_v20 = vmul.f32 -1.442695, %v1930_v11 }
 0x126   : > { %v1537_v31 = vpop.eup %1536  ;;  %1145 = vst [vmem:[%s1853_s24 + $0xb0] sm:$0xff] %v1113_v25  ;;  %v1111_v32 = vmul.f32 %v1535_v27, %v1794_v10  ;;  %1556 = vpow2.f32 %v1325_v16  ;;  %v1328_v16 = vmul.f32 -1.442695, %v1925_v42 }
 0x127   : > { %v1539_v22 = vpop.eup %1538  ;;  %1127 = vst [vmem:[%s1853_s24 + $0x20] sm:$0xff] %v1095_v30  ;;  %v1098_v5 = vmul.f32 %v1537_v31, %v1799_v13  ;;  %1558 = vpow2.f32 %v1341_v52  ;;  %v1946_v52 = vadd.f32 %v1737_v26, %v857_v43  ;;  %v1329_v26 = vmul.f32 -1.442695, %v1942_v24 }
 0x128   : > { %v1541_v34 = vpop.eup %1540  ;;  %1143 = vst [vmem:[%s1853_s24 + $0xa0] sm:$0xff] %v1111_v32  ;;  %v1018_v35 = vadd.f32 1.0, %v1539_v22  ;;  %1560 = vpow2.f32 %v1330_v53  ;;  %v1331_v53 = vmul.f32 -1.442695, %v1935_v6 }
 0x129   : > { %v1543_v28 = vpop.eup %1542  ;;  %1130 = vst [vmem:[%s1853_s24 + $0x38] sm:$0xff] %v1098_v5  ;;  %v1000_v9 = vadd.f32 1.0, %v1541_v34  ;;  %1562 = vpow2.f32 %v1346_v4  ;;  %v1347_v4 = vmul.f32 -1.442695, %v1938_v18 }
 0x12a   : > { %v1545_v39 = vpop.eup %1544  ;;  %1564 = vrcp.f32 %v1018_v35  ;;  %v1016_v40 = vadd.f32 1.0, %v1543_v28 }
 0x12b   : > { %v1547_v44 = vpop.eup %1546  ;;  %1566 = vrcp.f32 %v1000_v9  ;;  %v1005_v10 = vadd.f32 1.0, %v1545_v39 }
 0x12c   : > { %v1549_v46 = vpop.eup %1548  ;;  %1568 = vrcp.f32 %v1016_v40  ;;  %v1021_v13 = vadd.f32 1.0, %v1547_v44 }
 0x12d   : > { %v1551_v51 = vpop.eup %1550  ;;  %1570 = vrcp.f32 %v1005_v10  ;;  %v1003_v36 = vadd.f32 1.0, %v1549_v46 }
 0x12e   : > { %v1553_v56 = vpop.eup %1552  ;;  %1572 = vrcp.f32 %v1021_v13  ;;  %v1019_v37 = vadd.f32 1.0, %v1551_v51 }
 0x12f   : > { %v1555_v59 = vpop.eup %1554  ;;  %1574 = vrcp.f32 %v1003_v36  ;;  %v1006_v1 = vadd.f32 1.0, %v1553_v56 }
 0x130   : > { %v1557_v61 = vpop.eup %1556  ;;  %1576 = vrcp.f32 %v1019_v37  ;;  %v1022_v62 = vadd.f32 1.0, %v1555_v59 }
 0x131   : > { %v1559_v63 = vpop.eup %1558  ;;  %1578 = vrcp.f32 %v1006_v1  ;;  %v1004_v12 = vadd.f32 1.0, %v1557_v61 }
 0x132   : > { %v1561_v48 = vpop.eup %1560  ;;  %1580 = vrcp.f32 %v1022_v62  ;;  %v1020_v7 = vadd.f32 1.0, %v1559_v63 }
 0x133   : > { %v1563_v15 = vpop.eup %1562  ;;  %1582 = vrcp.f32 %v1004_v12  ;;  %v1009_v49 = vadd.f32 1.0, %v1561_v48 }
 0x134   : > { %v1565_v19 = vpop.eup %1564  ;;  %1584 = vrcp.f32 %v1020_v7  ;;  %v1025_v17 = vadd.f32 1.0, %v1563_v15 }
 0x135   : > { %v1567_v21 = vpop.eup %1566  ;;  %v1114_v25 = vmul.f32 %v1565_v19, %v1810_v41  ;;  %1586 = vrcp.f32 %v1009_v49 }
 0x136   : > { %v1569_v27 = vpop.eup %1568  ;;  %v1096_v30 = vmul.f32 %v1567_v21, %v1814_v47  ;;  %1588 = vrcp.f32 %v1025_v17  ;;  %v1345_v47 = vmul.f32 -1.442695, %v1946_v52 }
 0x137   : > { %v1571_v31 = vpop.eup %1570  ;;  %1146 = vst [vmem:[%s1853_s24 + $0xb8] sm:$0xff] %v1114_v25  ;;  %v1112_v32 = vmul.f32 %v1569_v27, %v1818_v55  ;;  %1590 = vpow2.f32 %v1328_v16 }
 0x138   : > { %v1573_v41 = vpop.eup %1572  ;;  %1128 = vst [vmem:[%s1853_s24 + $0x28] sm:$0xff] %v1096_v30  ;;  %v1101_v22 = vmul.f32 %v1571_v31, %v1823_v0  ;;  %1592 = vpow2.f32 %v1344_v20 }
 0x139   : > { %v1575_v5 = vpop.eup %1574  ;;  %1144 = vst [vmem:[%s1853_s24 + $0xa8] sm:$0xff] %v1112_v32  ;;  %v1117_v34 = vmul.f32 %v1573_v41, %v1831_v8  ;;  %1594 = vpow2.f32 %v1331_v53 }
 0x13a   : > { %v1577_v35 = vpop.eup %1576  ;;  %1133 = vst [vmem:[%s1853_s24 + $0x50] sm:$0xff] %v1101_v22  ;;  %v1099_v55 = vmul.f32 %v1575_v5, %v1845_v23  ;;  %1596 = vpow2.f32 %v1347_v4 }
 0x13b   : > { %v1579_v28 = vpop.eup %1578  ;;  %1149 = vst [vmem:[%s1853_s24 + $0xd0] sm:$0xff] %v1117_v34  ;;  %v1115_v0 = vmul.f32 %v1577_v35, %v1859_v29  ;;  %1598 = vpow2.f32 %v1329_v26 }
 0x13c   : > { %v1581_v9 = vpop.eup %1580  ;;  %1131 = vst [vmem:[%s1853_s24 + $0x40] sm:$0xff] %v1099_v55  ;;  %v1102_v39 = vmul.f32 %v1579_v28, %v1865_v50  ;;  %1600 = vpow2.f32 %v1345_v47 }
 0x13d   : > { %v1583_v8 = vpop.eup %1582  ;;  %1147 = vst [vmem:[%s1853_s24 + $0xc0] sm:$0xff] %v1115_v0  ;;  %v1118_v40 = vmul.f32 %v1581_v9, %v1871_v54 }
 0x13e   : > { %v1585_v23 = vpop.eup %1584  ;;  %1134 = vst [vmem:[%s1853_s24 + $0x58] sm:$0xff] %v1102_v39  ;;  %v1100_v44 = vmul.f32 %v1583_v8, %v1878_v58 }
 0x13f   : > { %v1587_v10 = vpop.eup %1586  ;;  %1150 = vst [vmem:[%s1853_s24 + $0xd8] sm:$0xff] %v1118_v40  ;;  %v1116_v29 = vmul.f32 %v1585_v23, %v1884_v60 }
 0x140   : > { %v1589_v45 = vpop.eup %1588  ;;  %1132 = vst [vmem:[%s1853_s24 + $0x48] sm:$0xff] %v1100_v44  ;;  %v1105_v46 = vmul.f32 %v1587_v10, %v1890_v3 }
 0x141   : > { %v1591_v50 = vpop.eup %1590  ;;  %1148 = vst [vmem:[%s1853_s24 + $0xc8] sm:$0xff] %v1116_v29  ;;  %v1121_v13 = vmul.f32 %v1589_v45, %v1896_v14 }
 0x142   : > { %v1593_v33 = vpop.eup %1592  ;;  %1137 = vst [vmem:[%s1853_s24 + $0x70] sm:$0xff] %v1105_v46  ;;  %v1007_v54 = vadd.f32 1.0, %v1591_v50 }
 0x143   : > { %v1595_v51 = vpop.eup %1594  ;;  %1153 = vst [vmem:[%s1853_s24 + $0xf0] sm:$0xff] %v1121_v13  ;;  %v1023_v36 = vadd.f32 1.0, %v1593_v33 }
 0x144   : > { %v1597_v38 = vpop.eup %1596  ;;  %1602 = vrcp.f32 %v1007_v54  ;;  %v1010_v58 = vadd.f32 1.0, %v1595_v51 }
 0x145   : > { %v1599_v56 = vpop.eup %1598  ;;  %1604 = vrcp.f32 %v1023_v36  ;;  %v1026_v60 = vadd.f32 1.0, %v1597_v38 }
 0x146   : > { %v1601_v37 = vpop.eup %1600  ;;  %1606 = vrcp.f32 %v1010_v58  ;;  %v1008_v3 = vadd.f32 1.0, %v1599_v56 }
 0x147   : > { %1608 = vrcp.f32 %v1026_v60  ;;  %v1024_v14 = vadd.f32 1.0, %v1601_v37 }
 0x148   : > { %1610 = vrcp.f32 %v1008_v3 }
 0x149   : > { %1612 = vrcp.f32 %v1024_v14 }
 0x14e   : > { %v1603_v57 = vpop.eup %1602 }
 0x14f   : > { %v1605_v59 = vpop.eup %1604  ;;  %v1103_v1 = vmul.f32 %v1603_v57, %v1925_v42 }
 0x150   : > { %v1607_v2 = vpop.eup %1606  ;;  %v1119_v61 = vmul.f32 %v1605_v59, %v1930_v11 }
 0x151   : > { %v1609_v62 = vpop.eup %1608  ;;  %1135 = vst [vmem:[%s1853_s24 + $0x60] sm:$0xff] %v1103_v1  ;;  %v1106_v43 = vmul.f32 %v1607_v2, %v1935_v6 }
 0x152   : > { %v1611_v63 = vpop.eup %1610  ;;  %1151 = vst [vmem:[%s1853_s24 + $0xe0] sm:$0xff] %v1119_v61  ;;  %v1122_v12 = vmul.f32 %v1609_v62, %v1938_v18 }
 0x153   : > { %v1613_v48 = vpop.eup %1612  ;;  %1138 = vst [vmem:[%s1853_s24 + $0x78] sm:$0xff] %v1106_v43  ;;  %v1104_v7 = vmul.f32 %v1611_v63, %v1942_v24 }
 0x154   : > { %1154 = vst [vmem:[%s1853_s24 + $0xf8] sm:$0xff] %v1122_v12  ;;  %v1120_v15 = vmul.f32 %v1613_v48, %v1946_v52 }
 0x155   : > { %1136 = vst [vmem:[%s1853_s24 + $0x68] sm:$0xff] %v1104_v7 }
 0x156   : > { %1152 = vst [vmem:[%s1853_s24 + $0xe8] sm:$0xff] %v1120_v15 }
 0x157 PF: > { %s14_s17 = sadd.s32 1, %s1636_s17   ;;  %s2004_s15 = smov %s1632_s16 }
 0x158   : > { %p11_p5 = scmp.ge.s32.totalorder %s14_s17, 4   ;;  %s2005_s16 = smov %s2007_s18 }
 0x15a   :  { %13 = sbr.rel (!%p11_p5) target bundleno = 2 (0x2), region = 83 }

</bundles_post_ra>
